<compile_context>
chip_gen: v5e
topology: v5e:2x2
jax: 0.10.0
libtpu: 0.0.40
codegen_flags: <defaults>
</compile_context>

<pallas_src>
import functools

import jax
import jax.numpy as jnp
from jax.experimental import pallas as pl
from jax.experimental.pallas import tpu as pltpu

EPS = 1e-6


def _decoder_norm_kernel(x_ref, o_ref, *, alpha, beta, eps):
    x = x_ref[...].astype(jnp.float32)                  # (TR, D)
    d = x.shape[-1]
    # Fused single-pass statistics: one pass over x for both sums.
    s1 = jnp.sum(x, axis=-1, keepdims=True)
    s2 = jnp.sum(x * x, axis=-1, keepdims=True)
    mean = s1 * (1.0 / d)
    # torch.std default: Bessel-corrected (divide by d - 1).
    var = (s2 - d * mean * mean) * (1.0 / (d - 1))
    var = jnp.maximum(var, 0.0)                         # guard tiny cancellation
    std = jnp.sqrt(var)
    inv = pl.reciprocal(std + eps, approx=False)        # exact; EUP slot, free (mem-bound)
    y = (x - mean) * inv
    if alpha != 1.0:                                    # elided for default init
        y = y * alpha
    if beta != 0.0:
        y = y + beta
    o_ref[...] = y.astype(o_ref.dtype)


def _vmem_capacity_bytes():
    # 128 MiB on v5e/v6e, 64 MiB per TC on v7x.  Fall back to the v7x-safe
    # number if the query is unavailable.
    try:
        return int(pltpu.get_tpu_info().vmem_capacity_bytes)
    except Exception:  # pragma: no cover - defensive
        return 64 * 1024 * 1024


def _tile_plan(n_rows, d, itemsize):
    """Returns (tile_rows, vmem_limit_bytes) for the streaming LayerNorm."""
    slab_bytes = n_rows * d * itemsize
    vmem_limit = min(64 * 1024 * 1024, _vmem_capacity_bytes() // 2)

    # Tiny slab: single full block; megacore split is irrelevant below ~1 MiB.
    if slab_bytes <= 1 * 1024 * 1024:
        return n_rows, vmem_limit

    # Per-row working-set bytes: 2x double-buffered input tile + 2x
    # double-buffered output tile (input dtype) + ~2 f32 (TR, D) temporaries
    # (upcast x and y) inside the body.
    per_row = d * (4 * itemsize + 8)
    budget = (vmem_limit * 3) // 4                      # headroom for compiler scratch
    tr = max(1, budget // per_row)

    # Guarantee >= 2 grid steps so v7x's 2 TensorCores both get work.
    tr = min(tr, -(-n_rows // 2))

    # Sublane alignment for tiled (non-full-R) blocks: 8 rows for f32,
    # 16 for bf16, 32 for int8/fp8.
    align = max(8, 32 // max(1, itemsize))
    if tr < n_rows:
        tr = max(align, (tr // align) * align)
    return min(tr, n_rows), vmem_limit


def layer_norm(x, *, alpha=1.0, beta=0.0, eps=EPS):
    """Torch-semantics LayerNormalization over the last axis of x."""
    orig_shape = x.shape
    d = orig_shape[-1]
    x2 = x.reshape(-1, d)
    r = x2.shape[0]
    itemsize = x2.dtype.itemsize
    tr, vmem_limit = _tile_plan(r, d, itemsize)

    kernel = functools.partial(
        _decoder_norm_kernel,
        alpha=float(alpha), beta=float(beta), eps=float(eps))

    cost = pl.CostEstimate(
        flops=5 * r * d,
        transcendentals=2 * r,
        bytes_accessed=2 * r * d * itemsize)

    out = pl.pallas_call(
        kernel,
        out_shape=jax.ShapeDtypeStruct((r, d), x.dtype),
        grid=(pl.cdiv(r, tr),),
        in_specs=[pl.BlockSpec((tr, d), lambda i: (i, 0))],
        out_specs=pl.BlockSpec((tr, d), lambda i: (i, 0)),
        compiler_params=pltpu.CompilerParams(
            dimension_semantics=("parallel",),
            vmem_limit_bytes=int(vmem_limit)),
        cost_estimate=cost,
    )(x2)
    return out.reshape(orig_shape)


def decoder_forward(x, encoder_output, src_mask, tgt_mask, layers=()):
    """Decoder.forward: apply each (opaque) layer, then the Pallas LayerNorm."""
    # TODO(synk): `layers` in the reference is an opaque nn.ModuleList whose
    # decoder blocks are not defined by this spec; they are applied here as
    # user-supplied JAX callables rather than faked inside the kernel.
    for layer in layers:
        x = layer(x, encoder_output, src_mask, tgt_mask)
    return layer_norm(x)


if __name__ == "__main__":
    key = jax.random.PRNGKey(0)
    k_x, k_e = jax.random.split(key, 2)

    # Small demo shapes; real d_model should be a multiple of 128 for
    # lane-dense stores / a well-filled VPU.
    B, S, D = 2, 8, 32
    x = jax.random.normal(k_x, (B, S, D), dtype=jnp.float32)
    encoder_output = jax.random.normal(k_e, (B, S, D), dtype=jnp.float32)
    src_mask = jnp.ones((B, 1, 1, S), dtype=jnp.float32)
    tgt_mask = jnp.tril(jnp.ones((S, S), dtype=jnp.float32))[None, None]

    out = decoder_forward(x, encoder_output, src_mask, tgt_mask, layers=())
    jax.block_until_ready(out)

    # Pure-JAX reference (torch semantics: unbiased std, eps added to std).
    xf = x.astype(jnp.float32)
    mean = xf.mean(-1, keepdims=True)
    std = jnp.sqrt(((xf - mean) ** 2).sum(-1, keepdims=True) / (D - 1))
    ref = ((xf - mean) / (std + EPS)).astype(x.dtype)

    assert out.shape == x.shape and out.dtype == x.dtype
    assert jnp.allclose(out, ref, rtol=1e-3, atol=1e-3), "mismatch vs reference"
    print("KERNEL_OK")
</pallas_src>

<mosaic_0001>
module attributes {stable_mosaic.version = 11 : i64} {
  func.func @_decoder_norm_kernel(%arg0: i32, %arg1: memref<16x32xf32, #tpu.memory_space<vmem>>, %arg2: memref<16x32xf32, #tpu.memory_space<vmem>>) attributes {dimension_semantics = [#tpu.dimension_semantics<parallel>], iteration_bounds = array<i64: 1>, scalar_prefetch = 0 : i64, scratch_operands = 0 : i64, tpu.core_type = #tpu.core_type<tc>, window_params = [{transform_indices = @transform_0, window_bounds = array<i64: 16, 32>}, {transform_indices = @transform_1, window_bounds = array<i64: 16, 32>}]} {
    %c0 = arith.constant 0 : index
    %c0_0 = arith.constant 0 : index
    %0 = vector.load %arg1[%c0, %c0_0] : memref<16x32xf32, #tpu.memory_space<vmem>>, vector<16x32xf32>
    %cst = arith.constant dense<0.000000e+00> : vector<16xf32>
    %1 = vector.multi_reduction <add>, %0, %cst [1] : vector<16x32xf32> to vector<16xf32>
    %2 = vector.shape_cast %1 : vector<16xf32> to vector<16x1xf32>
    %3 = arith.mulf %0, %0 : vector<16x32xf32>
    %cst_1 = arith.constant dense<0.000000e+00> : vector<16xf32>
    %4 = vector.multi_reduction <add>, %3, %cst_1 [1] : vector<16x32xf32> to vector<16xf32>
    %5 = vector.shape_cast %4 : vector<16xf32> to vector<16x1xf32>
    %cst_2 = arith.constant 3.125000e-02 : f32
    %6 = vector.broadcast %cst_2 : f32 to vector<16x1xf32>
    %7 = arith.mulf %2, %6 : vector<16x1xf32>
    %cst_3 = arith.constant 3.200000e+01 : f32
    %8 = vector.broadcast %cst_3 : f32 to vector<16x1xf32>
    %9 = arith.mulf %8, %7 : vector<16x1xf32>
    %10 = arith.mulf %9, %7 : vector<16x1xf32>
    %11 = arith.subf %5, %10 : vector<16x1xf32>
    %cst_4 = arith.constant 0.0322580636 : f32
    %12 = vector.broadcast %cst_4 : f32 to vector<16x1xf32>
    %13 = arith.mulf %11, %12 : vector<16x1xf32>
    %cst_5 = arith.constant 0.000000e+00 : f32
    %14 = vector.broadcast %cst_5 : f32 to vector<16x1xf32>
    %15 = arith.maximumf %13, %14 : vector<16x1xf32>
    %16 = math.sqrt %15 : vector<16x1xf32>
    %cst_6 = arith.constant 9.99999997E-7 : f32
    %17 = vector.broadcast %cst_6 : f32 to vector<16x1xf32>
    %18 = arith.addf %16, %17 : vector<16x1xf32>
    %19 = tpu.reciprocal %18 : vector<16x1xf32> -> vector<16x1xf32>
    %20 = vector.broadcast %7 : vector<16x1xf32> to vector<16x32xf32>
    %21 = arith.subf %0, %20 : vector<16x32xf32>
    %22 = vector.broadcast %19 : vector<16x1xf32> to vector<16x32xf32>
    %23 = arith.mulf %21, %22 : vector<16x32xf32>
    %c0_7 = arith.constant 0 : index
    %c0_8 = arith.constant 0 : index
    %24 = vector.load %arg2[%c0_7, %c0_8] : memref<16x32xf32, #tpu.memory_space<vmem>>, vector<16x32xf32>
    tpu.vector_store %arg2[%c0_7, %c0_8], %23 {strides = array<i32>} : memref<16x32xf32, #tpu.memory_space<vmem>>, vector<16x32xf32>,
    return
  }
  func.func @transform_0(%arg0: i32) -> (i32, i32) {
    %c0_i32 = arith.constant 0 : i32
    %c0_i32_0 = arith.constant 0 : i32
    return %arg0, %c0_i32 : i32, i32
  }
  func.func @transform_1(%arg0: i32) -> (i32, i32) {
    %c0_i32 = arith.constant 0 : i32
    %c0_i32_0 = arith.constant 0 : i32
    return %arg0, %c0_i32 : i32, i32
  }
}

</mosaic_0001>

<bundles_post_ra>
// kernel: tpu_custom_call.1
= control target key start
LH: loop header
LB: loop body
LE: loop exit
PB: predicated region body
PF: predicated region fallthrough
CT: control target
= control target key end

     0   :  { %6 = vsyncpa [#allocation3], 0  ;;  %s251_s0 = inlined_call_operand.hbm [shape: f32[16,32], index: 0, kind: input, shape index: {}]   ;;  %s252_s1 = inlined_call_operand.hbm [shape: f32[16,32], index: 1, kind: output, shape index: {}]  }
   0x1   :  { %7 = vsyncpa [#allocation4], 0  ;;  %s12_s8 = sshll.u32 %s251_s0, 4  ;;  %s197_s9 = smov [#allocation2]   ;;  %s13_s8 = int_to_ptr.hbm [resolvable:$true] %s12_s8 }
   0x2   :  { %s14_s10 = sshll.u32 %s197_s9, 4  ;;  %s198_s11 = smov 128   ;;  %s15_s10 = int_to_ptr.vmem [resolvable:$true] %s14_s10 }
   0x3   :  { %s199_s12 = smov 8  }
   0x4   :  { %20 = dma.hbm_to_vmem [thread:$0]  %s13_s8, 256, %s15_s10, [#allocation3], %s198_s11, %s198_s11, %s199_s12  }
   0x5   :  { %193 = dma.done.wait [#allocation3], 256  }
   0x6   :  { %194 = vsyncadd [#allocation3], 4294967040  ;;  %vm27_vm0 = vcmask 261120   ;;  %v217_v0 = vld [vmem:[#allocation2] sm:$0xff]  ;;  %v224_v4 = vld [vmem:[#allocation2 + $0x8] sm:$0xff]  ;;  %s200_s0 = smov [#allocation5]  }
   0x7   :  { %v28_v1 = vsel %vm27_vm0, %v217_v0, 0.0  ;;  %v34_v2 = vmul.f32 %v217_v0, %v217_v0  ;;  %v35_v5 = vmul.f32 %v224_v4, %v224_v4  ;;  %v31_v6 = vsel %vm27_vm0, %v224_v4, 0.0  ;;  %s118_s13 = sshll.u32 %s200_s0, 4  ;;  %s120_s16 = sshll.u32 %s252_s1, 4  ;;  %s119_s13 = int_to_ptr.vmem [resolvable:$true] %s118_s13  ;;  %s121_s16 = int_to_ptr.hbm [resolvable:$true] %s120_s16 }
   0x8   :  { %29 = vadd.xlane.f32.xlu0 %v28_v1 }
   0x9   :  { %v36_v3 = vsel %vm27_vm0, %v34_v2, 0.0  ;;  %v39_v7 = vsel %vm27_vm0, %v35_v5, 0.0 }
   0xa   :  { %37 = vadd.xlane.f32.xlu1 %v36_v3 }
  0x10   :  { %32 = vadd.xlane.f32.xlu0 %v31_v6 }
  0x12   :  { %40 = vadd.xlane.f32.xlu1 %v39_v7 }
  0x7b   :  { %v30_v8 = vpop.xlane.xlu0 %29 }
  0x7c   :  { %v231_v9 = vmul.f32 0.03125, %v30_v8 }
  0x7d   :  { %v38_v10 = vpop.xlane.xlu1 %37 }
  0x7e   :  { %v44_v11 = vmul.f32 32.0, %v231_v9  ;;  %v108_v55 = vsub.f32 %v217_v0, %v231_v9 }
  0x80   :  { %v46_v12 = vmul.f32 %v44_v11, %v231_v9 }
  0x82   :  { %v48_v13 = vsub.f32 %v38_v10, %v46_v12 }
  0x83   :  { %v33_v14 = vpop.xlane.xlu0 %32 }
  0x84   :  { %v50_v15 = vmul.f32 0.032258064, %v48_v13  ;;  %v235_v16 = vmul.f32 0.03125, %v33_v14 }
  0x85   :  { %v41_v19 = vpop.xlane.xlu1 %40 }
  0x86   :  { %v52_v17 = vmax.f32 %v50_v15, 0.0  ;;  %v45_v18 = vmul.f32 32.0, %v235_v16  ;;  %v109_v0 = vsub.f32 %v224_v4, %v235_v16 }
  0x88   :  { %137 = vrsqrt.f32 %v52_v17  ;;  %v47_v20 = vmul.f32 %v45_v18, %v235_v16  ;;  %vm61_vm1 = vcmp.eq.f32.partialorder %v52_v17, inf  ;;  %v64_v33 = vand.u32 2147483648, %v52_v17 }
  0x89   :  { %vm63_vm2 = vcmp.eq.f32.partialorder %v52_v17, 0.0 }
  0x8a   :  { %v49_v21 = vsub.f32 %v41_v19, %v47_v20 }
  0x8c   :  { %v51_v22 = vmul.f32 0.032258064, %v49_v21 }
  0x8e   :  { %v138_v23 = vpop.eup %137  ;;  %v53_v25 = vmax.f32 %v51_v22, 0.0 }
  0x8f   :  { %v55_v24 = vmul.f32 %v138_v23, %v52_v17 }
  0x90   :  { %139 = vrsqrt.f32 %v53_v25  ;;  %vm73_vm3 = vcmp.eq.f32.partialorder %v53_v25, inf  ;;  %v76_v42 = vand.u32 2147483648, %v53_v25  ;;  %vm75_vm4 = vcmp.eq.f32.partialorder %v53_v25, 0.0 }
  0x91   :  { %v56_v26 = vmul.f32 %v138_v23, %v55_v24 }
  0x93   :  { %v57_v27 = vmul.f32 0.5, %v56_v26 }
  0x95   :  { %v58_v28 = vsub.f32 1.5, %v57_v27 }
  0x96   :  { %v140_v29 = vpop.eup %139 }
  0x97   :  { %v59_v30 = vmul.f32 %v138_v23, %v58_v28  ;;  %v67_v31 = vmul.f32 %v140_v29, %v53_v25 }
  0x99   :  { %v60_v32 = vmul.f32 %v59_v30, %v52_v17  ;;  %v68_v34 = vmul.f32 %v140_v29, %v67_v31 }
  0x9b   :  { %v62_v35 = vsel %vm61_vm1, %v52_v17, %v60_v32  ;;  %v69_v36 = vmul.f32 0.5, %v68_v34 }
  0x9c   :  { %v65_v37 = vsel %vm63_vm2, %v64_v33, %v62_v35 }
  0x9d   :  { %v78_v38 = vadd.f32 1e-06, %v65_v37  ;;  %v70_v39 = vsub.f32 1.5, %v69_v36 }
  0x9f   :  { %141 = vrcp.f32 %v78_v38  ;;  %v71_v40 = vmul.f32 %v140_v29, %v70_v39  ;;  %v91_v49 = vand.u32 2147483648, %v78_v38  ;;  %v89_v51 = vand.u32 2147483647, %v78_v38 }
  0xa0   :  { %vm85_vm6 = vweird.f32 %v78_v38 }
  0xa1   :  { %v72_v41 = vmul.f32 %v71_v40, %v53_v25  ;;  %v92_v53 = vor.u32 1.1754944e-38, %v91_v49  ;;  %vm90_vm8 = vcmp.eq.f32.partialorder %v89_v51, 8.507059e+37 }
  0xa3   :  { %v74_v43 = vsel %vm73_vm3, %v53_v25, %v72_v41 }
  0xa4   :  { %v77_v45 = vsel %vm75_vm4, %v76_v42, %v74_v43 }
  0xa5   :  { %v142_v44 = vpop.eup %141  ;;  %v79_v46 = vadd.f32 1e-06, %v77_v45 }
  0xa6   :  { %v81_v47 = vmul.f32 %v142_v44, %v78_v38  ;;  %vm86_vm5 = vweird.f32 %v142_v44 }
  0xa7   :  { %143 = vrcp.f32 %v79_v46  ;;  %vm87_vm7 = vmor %vm85_vm6, %vm86_vm5  ;;  %v105_v61 = vand.u32 2147483648, %v79_v46  ;;  %v103_v63 = vand.u32 2147483647, %v79_v46  ;;  %vm99_vm10 = vweird.f32 %v79_v46 }
  0xa8   :  { %v82_v48 = vsub.f32 1.0, %v81_v47 }
  0xa9   :  { %v106_v2 = vor.u32 1.1754944e-38, %v105_v61  ;;  %vm104_vm12 = vcmp.eq.f32.partialorder %v103_v63, 8.507059e+37 }
  0xaa   :  { %v83_v50 = vmul.f32 %v142_v44, %v82_v48 }
  0xac   :  { %v84_v52 = vadd.f32 %v142_v44, %v83_v50 }
  0xad   :  { %v144_v54 = vpop.eup %143 }
  0xae   :  { %v88_v56 = vsel %vm87_vm7, %v142_v44, %v84_v52  ;;  %v95_v58 = vmul.f32 %v144_v54, %v79_v46  ;;  %vm100_vm9 = vweird.f32 %v144_v54 }
  0xaf   :  { %v93_v57 = vsel %vm90_vm8, %v92_v53, %v88_v56  ;;  %vm101_vm11 = vmor %vm99_vm10, %vm100_vm9 }
  0xb0   :  { %v110_v59 = vmul.f32 %v108_v55, %v93_v57  ;;  %v96_v60 = vsub.f32 1.0, %v95_v58 }
  0xb2   :  { %112 = vst.msk [vmem:[#allocation5] sm:$0xff] %vm27_vm0, %v110_v59  ;;  %v97_v62 = vmul.f32 %v144_v54, %v96_v60 }
  0xb4   :  { %v98_v1 = vadd.f32 %v144_v54, %v97_v62 }
  0xb6   :  { %v102_v3 = vsel %vm101_vm11, %v144_v54, %v98_v1 }
  0xb7   :  { %v107_v5 = vsel %vm104_vm12, %v106_v2, %v102_v3 }
  0xb8   :  { %v111_v6 = vmul.f32 %v109_v0, %v107_v5 }
  0xba   :  { %113 = vst.msk [vmem:[#allocation5 + $0x8] sm:$0xff] %vm27_vm0, %v111_v6 }
  0xbb   :  { %126 = dma.vmem_to_hbm [thread:$0]  %s119_s13, 256, %s121_s16, [#allocation4], %s198_s11, %s198_s11, %s199_s12  }
  0xbc   :  { %195 = dma.done.wait [#allocation4], 256  }
  0xbd   :  { %196 = vsyncadd [#allocation4], 4294967040 }
  0xbe   :  { %131 = vsyncpa [#allocation3], 1 }
  0xbf   :  { %132 = vsyncpa [#allocation4], 1 }

</bundles_post_ra>
